<compile_context>
chip_gen: v6e
topology: v6e:2x2x1
jax: 0.10.0
libtpu: 0.0.40
codegen_flags: <defaults>
</compile_context>

<pallas_src>
import functools

import jax
import jax.numpy as jnp
from jax import lax
from jax.experimental import pallas as pl
from jax.experimental.pallas import tpu as pltpu


def _sublane_align(dtype):
    """Rows per sublane group: f32 -> 8, bf16/f16 -> 16, int8/fp8 -> 32."""
    itemsize = jnp.dtype(dtype).itemsize
    return {4: 8, 2: 16, 1: 32}.get(itemsize, 8)


def _choose_rows_per_block(num_rows, row_bytes, dtype,
                           target_tile_bytes=8 << 20):
    """Pick a sublane-aligned row-block size near target_tile_bytes.

    No divisibility requirement on num_rows: callers use a cdiv grid and the
    ragged last block is masked by Pallas. For inputs larger than a couple of
    sublane groups, the block is capped at ~num_rows/2 so the grid has at
    least 2 steps (lets v7x's two TensorCores both get work).
    """
    align = _sublane_align(dtype)
    cap = max(1, target_tile_bytes // max(1, row_bytes))
    if num_rows > 2 * align:
        cap = min(cap, max(align, num_rows // 2))
    if cap >= num_rows:
        return num_rows  # tiny input: single full block
    rows = max(align, (cap // align) * align)
    return min(rows, num_rows)


def _row_channel_kernel(x_ref, o_ref, *, channels, rows_per_block):
    # x_ref / o_ref: (rows_per_block, H*W) lane-dense tiles of the flattened
    # [B*C, H*W] view. Global row r corresponds to channel (r % channels).
    rows, _ = x_ref.shape
    row0 = pl.program_id(0) * rows_per_block
    row_idx = row0 + lax.broadcasted_iota(jnp.int32, (rows, 1), 0)
    chan = (row_idx % channels).astype(jnp.float32)           # (rows, 1)
    # (x + 2) * 3 / 4 + c  ->  x * 0.75 + (1.5 + c); compute in f32.
    y = x_ref[...].astype(jnp.float32) * 0.75 + (chan + 1.5)
    o_ref[...] = y.astype(o_ref.dtype)


def _lane_channel_kernel(x_ref, o_ref, *, channels, hw):
    # x_ref / o_ref: (rows_per_block, C*H*W) tiles of the [B, C*H*W] view.
    # Channel of lane column j is (j // (H*W)) % C.
    _, cols = x_ref.shape
    lane = lax.broadcasted_iota(jnp.int32, (1, cols), 1)
    chan = ((lane // hw) % channels).astype(jnp.float32)       # (1, cols)
    y = x_ref[...].astype(jnp.float32) * 0.75 + (chan + 1.5)
    o_ref[...] = y.astype(o_ref.dtype)


def _run_elementwise(x2, kernel, rows_per_block):
    R, L = x2.shape
    itemsize = x2.dtype.itemsize
    grid = (pl.cdiv(R, rows_per_block),)

    tile_bytes = rows_per_block * L * itemsize
    # Real footprint under default double buffering ~= 4x tile (2 in + 2 out);
    # add headroom, keep >= 16 MiB, cap at 48 MiB (v7x has only 64 MiB VMEM).
    vmem_limit = int(min(max(4 * tile_bytes + (4 << 20), 16 << 20), 48 << 20))

    cost = pl.CostEstimate(
        flops=2 * R * L,
        transcendentals=0,
        bytes_accessed=2 * R * L * itemsize,
    )

    return pl.pallas_call(
        kernel,
        out_shape=jax.ShapeDtypeStruct((R, L), x2.dtype),
        grid=grid,
        in_specs=[pl.BlockSpec((rows_per_block, L), lambda i: (i, 0))],
        out_specs=pl.BlockSpec((rows_per_block, L), lambda i: (i, 0)),
        compiler_params=pltpu.CompilerParams(
            dimension_semantics=("parallel",),
            vmem_limit_bytes=vmem_limit,
        ),
        cost_estimate=cost,
    )(x2)


def pt_module_forward(x):
    """Pallas implementation of PtModule.forward. x: [B, C, H, W]."""
    B, C, H, W = x.shape
    HW = H * W
    itemsize = x.dtype.itemsize

    if HW >= 128:
        # Lane-dense primary path: [B*C, H*W], channel from the row index.
        R, L = B * C, HW
        x2 = x.reshape(R, L)
        rows_per_block = _choose_rows_per_block(R, L * itemsize, x.dtype)
        kernel = functools.partial(
            _row_channel_kernel, channels=C, rows_per_block=rows_per_block)
        y2 = _run_elementwise(x2, kernel, rows_per_block)
    else:
        # Narrow-spatial fallback: keep the lane dim wide with [B, C*H*W];
        # channel comes from the lane index.
        R, L = B, C * HW
        x2 = x.reshape(R, L)
        rows_per_block = _choose_rows_per_block(R, L * itemsize, x.dtype)
        kernel = functools.partial(_lane_channel_kernel, channels=C, hw=HW)
        y2 = _run_elementwise(x2, kernel, rows_per_block)

    return y2.reshape(B, C, H, W)


def _reference(x):
    # Pure-JAX reference mirroring the PyTorch op order.
    B, C, H, W = x.shape
    y = (x + 2.0) * 3.0 / 4.0
    chan = jnp.arange(C, dtype=x.dtype).reshape(1, C, 1, 1)
    return y + chan


if __name__ == "__main__":
    key = jax.random.PRNGKey(0)
    B, C, H, W = 2, 4, 16, 16
    x = jax.random.normal(key, (B, C, H, W), dtype=jnp.float32)

    out = jax.block_until_ready(pt_module_forward(x))
    ref = _reference(x)

    assert out.shape == (B, C, H, W)
    assert jnp.allclose(out, ref, atol=1e-5, rtol=1e-5), "mismatch vs reference"

    print("KERNEL_OK")
</pallas_src>

<mosaic_0001>
module attributes {stable_mosaic.version = 11 : i64} {
  func.func @_row_channel_kernel(%arg0: i32, %arg1: memref<8x256xf32, #tpu.memory_space<vmem>>, %arg2: memref<8x256xf32, #tpu.memory_space<vmem>>) attributes {dimension_semantics = [#tpu.dimension_semantics<parallel>], iteration_bounds = array<i64: 1>, scalar_prefetch = 0 : i64, scratch_operands = 0 : i64, tpu.core_type = #tpu.core_type<tc>, window_params = [{transform_indices = @transform_0, window_bounds = array<i64: 8, 256>}, {transform_indices = @transform_1, window_bounds = array<i64: 8, 256>}]} {
    %c8_i32 = arith.constant 8 : i32
    %0 = arith.muli %arg0, %c8_i32 : i32
    %1 = tpu.iota {dimensions = array<i32: 0>} : vector<8x1xi32>
    %2 = vector.broadcast %0 : i32 to vector<8x1xi32>
    %3 = arith.addi %2, %1 : vector<8x1xi32>
    %c4_i32 = arith.constant 4 : i32
    %c0_i32 = arith.constant 0 : i32
    %4 = arith.cmpi eq, %c4_i32, %c0_i32 : i32
    %c1_i32 = arith.constant 1 : i32
    %5 = arith.select %4, %c1_i32, %c4_i32 : i32
    %6 = vector.broadcast %5 : i32 to vector<8x1xi32>
    %7 = arith.remsi %3, %6 : vector<8x1xi32>
    %c0_i32_0 = arith.constant 0 : i32
    %8 = vector.broadcast %c0_i32_0 : i32 to vector<8x1xi32>
    %9 = arith.cmpi ne, %7, %8 : vector<8x1xi32>
    %c0_i32_1 = arith.constant 0 : i32
    %10 = vector.broadcast %c0_i32_1 : i32 to vector<8x1xi32>
    %11 = arith.cmpi slt, %7, %10 : vector<8x1xi32>
    %c0_i32_2 = arith.constant 0 : i32
    %12 = arith.cmpi slt, %5, %c0_i32_2 : i32
    %13 = vector.broadcast %12 : i1 to vector<8x1xi1>
    %14 = vector.broadcast %13 : vector<8x1xi1> to vector<8x1xi1>
    %15 = arith.xori %11, %14 : vector<8x1xi1>
    %16 = arith.andi %15, %9 : vector<8x1xi1>
    %17 = vector.broadcast %5 : i32 to vector<8x1xi32>
    %18 = arith.addi %7, %17 : vector<8x1xi32>
    %19 = arith.select %16, %18, %7 : vector<8x1xi1>, vector<8x1xi32>
    %20 = arith.sitofp %19 : vector<8x1xi32> to vector<8x1xf32>
    %c0 = arith.constant 0 : index
    %c0_3 = arith.constant 0 : index
    %21 = vector.load %arg1[%c0, %c0_3] : memref<8x256xf32, #tpu.memory_space<vmem>>, vector<8x256xf32>
    %cst = arith.constant 7.500000e-01 : f32
    %22 = vector.broadcast %cst : f32 to vector<8x256xf32>
    %23 = arith.mulf %21, %22 : vector<8x256xf32>
    %cst_4 = arith.constant 1.500000e+00 : f32
    %24 = vector.broadcast %cst_4 : f32 to vector<8x1xf32>
    %25 = arith.addf %20, %24 : vector<8x1xf32>
    %26 = vector.broadcast %25 : vector<8x1xf32> to vector<8x256xf32>
    %27 = arith.addf %23, %26 : vector<8x256xf32>
    %c0_5 = arith.constant 0 : index
    %c0_6 = arith.constant 0 : index
    %28 = vector.load %arg2[%c0_5, %c0_6] : memref<8x256xf32, #tpu.memory_space<vmem>>, vector<8x256xf32>
    tpu.vector_store %arg2[%c0_5, %c0_6], %27 {strides = array<i32>} : memref<8x256xf32, #tpu.memory_space<vmem>>, vector<8x256xf32>,
    return
  }
  func.func @transform_0(%arg0: i32) -> (i32, i32) {
    %c0_i32 = arith.constant 0 : i32
    %c0_i32_0 = arith.constant 0 : i32
    return %arg0, %c0_i32 : i32, i32
  }
  func.func @transform_1(%arg0: i32) -> (i32, i32) {
    %c0_i32 = arith.constant 0 : i32
    %c0_i32_0 = arith.constant 0 : i32
    return %arg0, %c0_i32 : i32, i32
  }
}

</mosaic_0001>

<bundles_post_ra>
// kernel: tpu_custom_call.1
= control target key start
LH: loop header
LB: loop body
LE: loop exit
PB: predicated region body
PF: predicated region fallthrough
CT: control target
= control target key end

     0   :  { %6 = vsyncpa [#allocation3], 0  ;;  %s127_s0 = inlined_call_operand.hbm [shape: f32[8,256], index: 0, kind: input, shape index: {}]   ;;  %s128_s1 = inlined_call_operand.hbm [shape: f32[8,256], index: 1, kind: output, shape index: {}]  }
   0x1   :  { %7 = vsyncpa [#allocation4], 0  ;;  %s109_s6 = smov [#allocation2]  }
   0x2   :  { %s14_s7 = sshll.u32 %s109_s6, 4  ;;  %s15_s7 = int_to_ptr.vmem [resolvable:$true] %s14_s7 }
   0x3   :  { %s73_s8 = scalar_lea.vmem %s15_s7, 256  ;;  %p78_p1 = scmp.lt.s32.totalorder %s15_s7, %s15_s7 }
   0x4   :  { %p74_p0 = scmp.ne.s32.totalorder %s15_s7, %s73_s8  ;;  %p79_p2 = scmp.lt.s32.totalorder %s73_s8, %s73_s8 }
   0x6   :  { %p80_p3 = por %p79_p2, %p78_p1 }
   0x8   :  { %p81_p4 = pnand %p80_p3, %p74_p0 }
   0xa   :  { %84 = shalt.err (!%p81_p4)
}
   0xb   :  { %17 = dma.hbm_to_vmem [thread:$0]  %s127_s0, 256, %s15_s7, [#allocation3]  }
   0xc   :  { %105 = dma.done.wait [#allocation3], 256  }
   0xd   :  { %106 = vsyncadd [#allocation3], 4294967040  ;;  %v22_v0 = vlaneseq  ;;  %v39_v4 = vld [vmem:[#allocation2] sm:$0xff]  ;;  %v40_v5 = vld [vmem:[#allocation2 + $0x8] sm:$0xff]  ;;  %s110_s11 = smov [#allocation5]  }
   0xe   :  { %s54_s12 = sshll.u32 %s110_s11, 4  ;;  %v41_v6 = vmul.f32 0.75, %v39_v4  ;;  %v42_v8 = vmul.f32 0.75, %v40_v5  ;;  %s55_s12 = int_to_ptr.vmem [resolvable:$true] %s54_s12 }
   0xf   :  { %v23_v1 = vshrl.u32 %v22_v0, 7  ;;  %s85_s13 = scalar_lea.vmem %s55_s12, 256  ;;  %p90_p6 = scmp.lt.s32.totalorder %s55_s12, %s55_s12 }
  0x10   :  { %p86_p5 = scmp.ne.s32.totalorder %s55_s12, %s85_s13  ;;  %p91_p7 = scmp.lt.s32.totalorder %s85_s13, %s85_s13 }
  0x11   :  { %v30_v2 = vand.u32 3, %v23_v1 }
  0x12   :  { %p92_p8 = por %p91_p7, %p90_p6 }
  0x13   :  { %v38_v3 = vcvt.s32.f32 %v30_v2 }
  0x14   :  { %p93_p9 = pnand %p92_p8, %p86_p5 }
  0x15   :  { %v43_v7 = vadd.f32 1.5, %v38_v3 }
  0x17   :  { %v44_v9 = vadd.f32 %v43_v7, %v41_v6  ;;  %v45_v10 = vadd.f32 %v43_v7, %v42_v8 }
  0x19   :  { %46 = vst [vmem:[#allocation5] sm:$0xff] %v44_v9  ;;  %47 = vst [vmem:[#allocation5 + $0x8] sm:$0xff] %v45_v10 }
  0x1a   :  { %96 = shalt.err (!%p93_p9)
}
  0x1b   :  { %57 = dma.vmem_to_hbm [thread:$0]  %s55_s12, 256, %s128_s1, [#allocation4]  }
  0x1c   :  { %107 = dma.done.wait [#allocation4], 256  }
  0x1d   :  { %108 = vsyncadd [#allocation4], 4294967040 }
  0x1e   :  { %61 = vsyncpa [#allocation3], 1 }
  0x1f   :  { %62 = vsyncpa [#allocation4], 1 }

</bundles_post_ra>
